<compile_context>
chip_gen: v7x
topology: tpu7x:2x2x1
jax: 0.10.0
libtpu: 0.0.40
codegen_flags: <defaults>
</compile_context>

<pallas_src>
import jax
import jax.numpy as jnp
from jax.experimental import pallas as pl
from jax.experimental.pallas import tpu as pltpu

EPS = 1e-5


def _stats_kernel(x_ref, w_ref, sum_ref, sq_ref):
    # x_ref: (Cin, TM)   w_ref: (CKK, Cin)   -> per-row partial sums over this M block.
    # Zero-padded M columns contribute exactly 0 to both sums, so no masking is needed.
    y = jnp.dot(w_ref[...], x_ref[...], preferred_element_type=jnp.float32)  # (CKK, TM)
    sum_ref[...] = jnp.sum(y, axis=1, keepdims=True)
    sq_ref[...] = jnp.sum(y * y, axis=1, keepdims=True)


def _norm_kernel(x_ref, w_ref, scale_ref, shift_ref, o_ref):
    # Recompute the (cheap) GEMM and apply fused BN affine + ReLU; lane-dense store.
    y = jnp.dot(w_ref[...], x_ref[...], preferred_element_type=jnp.float32)  # (CKK, TM)
    o_ref[...] = jnp.maximum(y * scale_ref[...] + shift_ref[...], 0.0)


def deconv_block_forward(x, weight, bias, gamma, beta, *, tm_max=2048):
    """x: (N, Cin, H, W) f32; weight: (Cin, Cout, 2, 2); bias/gamma/beta: (Cout,)."""
    N, Cin, H, W = x.shape
    Cin_w, Cout, KH, KW = weight.shape
    assert Cin == Cin_w and KH == 2 and KW == 2
    KK = KH * KW
    CKK = Cout * KK
    M = N * H * W
    H2, W2 = H * KH, W * KW

    # Lane-dense operand layouts: M on the lane axis, tiny Cin / CKK on sublanes.
    xT = jnp.transpose(x, (1, 0, 2, 3)).reshape(Cin, M).astype(jnp.float32)          # (Cin, M)
    wT = jnp.transpose(weight, (1, 2, 3, 0)).reshape(CKK, Cin).astype(jnp.float32)   # (CKK, Cin)

    # Tile M into 128-aligned blocks (<= tm_max) and pad M with zero columns if needed.
    if M <= tm_max:
        TM = max(128, ((M + 127) // 128) * 128)
    else:
        TM = tm_max
    M_pad = ((M + TM - 1) // TM) * TM
    grid_m = M_pad // TM
    if M_pad != M:
        xT = jnp.pad(xT, ((0, 0), (0, M_pad - M)))

    cparams = pltpu.CompilerParams(
        dimension_semantics=("parallel",),       # shard the M grid across TCs (v7x megacore)
        vmem_limit_bytes=32 * 1024 * 1024,       # blocks are small; stays well under budget
    )

    # ---- pass 1: per-block partial BN statistics of W@X (bias-free; Var is bias-invariant) ----
    sums, sqs = pl.pallas_call(
        _stats_kernel,
        grid=(grid_m,),
        in_specs=[
            pl.BlockSpec((Cin, TM), lambda i: (0, i)),
            pl.BlockSpec((CKK, Cin), lambda i: (0, 0)),
        ],
        out_specs=[
            pl.BlockSpec((CKK, 1), lambda i: (i, 0)),
            pl.BlockSpec((CKK, 1), lambda i: (i, 0)),
        ],
        out_shape=[
            jax.ShapeDtypeStruct((grid_m * CKK, 1), jnp.float32),
            jax.ShapeDtypeStruct((grid_m * CKK, 1), jnp.float32),
        ],
        compiler_params=cparams,
    )(xT, wT)

    # ---- tiny (Cout-sized) cross-block reduction + BN coefficient folding in the wrapper ----
    count = float(M * KK)  # = N * H2 * W2 real elements; padded columns contributed 0
    row_sum = sums.reshape(grid_m, CKK).sum(axis=0).reshape(Cout, KK)
    row_sq = sqs.reshape(grid_m, CKK).sum(axis=0).reshape(Cout, KK)
    mean_wx = row_sum.sum(axis=1) / count
    var = row_sq.sum(axis=1) / count - mean_wx * mean_wx      # Var(W@X + bias) == Var(W@X)
    var = jnp.maximum(var, 0.0)                               # guard f32 cancellation
    inv = jax.lax.rsqrt(var + EPS)

    bias_f = bias.astype(jnp.float32)
    gamma_f = gamma.astype(jnp.float32)
    beta_f = beta.astype(jnp.float32)
    mean_y = mean_wx + bias_f                                 # batch mean of the deconv output
    scale_c = gamma_f * inv                                   # per-channel BN scale
    shift_c = beta_f + (bias_f - mean_y) * scale_c            # folds deconv bias + BN shift
    scale_r = jnp.repeat(scale_c, KK).reshape(CKK, 1)         # per (cout,ki,kj) row
    shift_r = jnp.repeat(shift_c, KK).reshape(CKK, 1)

    # ---- pass 2: recompute GEMM + fused BN affine + ReLU, lane-dense (CKK, M_pad) output ----
    out2d = pl.pallas_call(
        _norm_kernel,
        grid=(grid_m,),
        in_specs=[
            pl.BlockSpec((Cin, TM), lambda i: (0, i)),
            pl.BlockSpec((CKK, Cin), lambda i: (0, 0)),
            pl.BlockSpec((CKK, 1), lambda i: (0, 0)),
            pl.BlockSpec((CKK, 1), lambda i: (0, 0)),
        ],
        out_specs=pl.BlockSpec((CKK, TM), lambda i: (0, i)),
        out_shape=jax.ShapeDtypeStruct((CKK, M_pad), jnp.float32),
        compiler_params=cparams,
    )(xT, wT, scale_r, shift_r)

    # ---- single NCHW scatter at the very end: (Cout,KH,KW,N,H,W) -> (N,Cout,2H,2W) ----
    out2d = out2d[:, :M]
    out = out2d.reshape(Cout, KH, KW, N, H, W)
    out = jnp.transpose(out, (3, 0, 4, 1, 5, 2)).reshape(N, Cout, H2, W2)
    return out


def _reference(x, weight, bias, gamma, beta):
    # pure-JAX reference of the same forward pass (for verification).
    N, Cin, H, W = x.shape
    _, Cout, KH, KW = weight.shape
    y = jnp.einsum('nihw,iokl->nohkwl', x, weight)
    y = y.reshape(N, Cout, H * KH, W * KW) + bias[None, :, None, None]
    mean = jnp.mean(y, axis=(0, 2, 3), keepdims=True)
    var = jnp.mean((y - mean) ** 2, axis=(0, 2, 3), keepdims=True)
    y = (y - mean) * jax.lax.rsqrt(var + EPS)
    y = y * gamma[None, :, None, None] + beta[None, :, None, None]
    return jnp.maximum(y, 0.0)


if __name__ == "__main__":
    N, Cin, Cout, H, W = 2, 4, 8, 16, 16

    key = jax.random.PRNGKey(0)
    kx, kw, kb = jax.random.split(key, 3)
    x = jax.random.normal(kx, (N, Cin, H, W), dtype=jnp.float32)
    # ConvTranspose2d parameter shapes: weight (Cin, Cout, 2, 2), bias (Cout,)
    weight = 0.1 * jax.random.normal(kw, (Cin, Cout, 2, 2), dtype=jnp.float32)
    bias = 0.1 * jax.random.normal(kb, (Cout,), dtype=jnp.float32)
    # BatchNorm2d default init: weight (gamma) = 1, bias (beta) = 0
    gamma = jnp.ones((Cout,), dtype=jnp.float32)
    beta = jnp.zeros((Cout,), dtype=jnp.float32)

    out = deconv_block_forward(x, weight, bias, gamma, beta)
    out = jax.block_until_ready(out)

    ref = _reference(x, weight, bias, gamma, beta)
    assert out.shape == (N, Cout, 2 * H, 2 * W), out.shape
    err = float(jnp.max(jnp.abs(out - ref)))
    assert err < 1e-3, err

    print("KERNEL_OK")
</pallas_src>

<mosaic_0001>
module attributes {stable_mosaic.version = 11 : i64} {
  func.func @_stats_kernel(%arg0: i32, %arg1: memref<4x512xf32, #tpu.memory_space<vmem>>, %arg2: memref<32x4xf32, #tpu.memory_space<vmem>>, %arg3: memref<32x1xf32, #tpu.memory_space<vmem>>, %arg4: memref<32x1xf32, #tpu.memory_space<vmem>>) attributes {dimension_semantics = [#tpu.dimension_semantics<parallel>], iteration_bounds = array<i64: 1>, scalar_prefetch = 0 : i64, scratch_operands = 0 : i64, tpu.core_type = #tpu.core_type<tc>, window_params = [{transform_indices = @transform_0, window_bounds = array<i64: 4, 512>}, {pipeline_mode = #tpu.pipeline_mode<synchronous>, transform_indices = @transform_1, window_bounds = array<i64: 32, 4>}, {transform_indices = @transform_2, window_bounds = array<i64: 32, 1>}, {transform_indices = @transform_3, window_bounds = array<i64: 32, 1>}]} {
    %c0 = arith.constant 0 : index
    %c0_0 = arith.constant 0 : index
    %0 = vector.load %arg2[%c0, %c0_0] : memref<32x4xf32, #tpu.memory_space<vmem>>, vector<32x4xf32>
    %c0_1 = arith.constant 0 : index
    %c0_2 = arith.constant 0 : index
    %1 = vector.load %arg1[%c0_1, %c0_2] : memref<4x512xf32, #tpu.memory_space<vmem>>, vector<4x512xf32>
    %cst = arith.constant dense<0.000000e+00> : vector<32x512xf32>
    %2 = tpu.matmul %0, %1, %cst {dimension_numbers = #tpu.dot_dimension_numbers<[1], [0], [0], [1], [0, 0, 1, 1], [], []>} : vector<32x4xf32>, vector<4x512xf32>, vector<32x512xf32> -> vector<32x512xf32>
    %cst_3 = arith.constant dense<0.000000e+00> : vector<32xf32>
    %3 = vector.multi_reduction <add>, %2, %cst_3 [1] : vector<32x512xf32> to vector<32xf32>
    %4 = vector.shape_cast %3 : vector<32xf32> to vector<32x1xf32>
    %c0_4 = arith.constant 0 : index
    %c0_5 = arith.constant 0 : index
    %5 = vector.load %arg3[%c0_4, %c0_5] : memref<32x1xf32, #tpu.memory_space<vmem>>, vector<32x1xf32>
    tpu.vector_store %arg3[%c0_4, %c0_5], %4 {strides = array<i32>} : memref<32x1xf32, #tpu.memory_space<vmem>>, vector<32x1xf32>,
    %6 = arith.mulf %2, %2 : vector<32x512xf32>
    %cst_6 = arith.constant dense<0.000000e+00> : vector<32xf32>
    %7 = vector.multi_reduction <add>, %6, %cst_6 [1] : vector<32x512xf32> to vector<32xf32>
    %8 = vector.shape_cast %7 : vector<32xf32> to vector<32x1xf32>
    %c0_7 = arith.constant 0 : index
    %c0_8 = arith.constant 0 : index
    %9 = vector.load %arg4[%c0_7, %c0_8] : memref<32x1xf32, #tpu.memory_space<vmem>>, vector<32x1xf32>
    tpu.vector_store %arg4[%c0_7, %c0_8], %8 {strides = array<i32>} : memref<32x1xf32, #tpu.memory_space<vmem>>, vector<32x1xf32>,
    return
  }
  func.func @transform_0(%arg0: i32) -> (i32, i32) {
    %c0_i32 = arith.constant 0 : i32
    %c0_i32_0 = arith.constant 0 : i32
    return %c0_i32, %arg0 : i32, i32
  }
  func.func @transform_1(%arg0: i32) -> (i32, i32) {
    %c0_i32 = arith.constant 0 : i32
    %c0_i32_0 = arith.constant 0 : i32
    %c0_i32_1 = arith.constant 0 : i32
    return %c0_i32, %c0_i32_0 : i32, i32
  }
  func.func @transform_2(%arg0: i32) -> (i32, i32) {
    %c0_i32 = arith.constant 0 : i32
    %c0_i32_0 = arith.constant 0 : i32
    return %arg0, %c0_i32 : i32, i32
  }
  func.func @transform_3(%arg0: i32) -> (i32, i32) {
    %c0_i32 = arith.constant 0 : i32
    %c0_i32_0 = arith.constant 0 : i32
    return %arg0, %c0_i32 : i32, i32
  }
}

</mosaic_0001>

<bundles_post_ra>
// kernel: tpu_custom_call.1
= control target key start
LH: loop header
LB: loop body
LE: loop exit
PB: predicated region body
PF: predicated region fallthrough
CT: control target
= control target key end

     0   :  { %vm36_vm0 = vcmask 1043456   ;;  %v311_v1 = vmov 0.0   ;;  %vm23_vm1 = vcmask 31744   ;;  %vm243_vm2 = vcmask 7168   ;;  %s390_s0 = inlined_call_operand.vmem [shape: f32[4,512], index: 0, kind: input, shape index: {}]   ;;  %s391_s1 = inlined_call_operand.vmem [shape: f32[32,4], index: 1, kind: input, shape index: {}]   ;;  %s392_s2 = inlined_call_operand.vmem [shape: f32[32,1], index: 2, kind: output, shape index: {0}]   ;;  %s393_s3 = inlined_call_operand.vmem [shape: f32[32,1], index: 3, kind: output, shape index: {1}]  }
   0x1   :  { %v17_v0 = vld [vmem:[%s390_s0] sm:$0xff]  ;;  %109 = vmatprep.mubr.f32.mxu0 %v311_v1  ;;  %v18_v2 = vld [vmem:[%s390_s0 + $0x8] sm:$0xff]  ;;  %198 = vmatprep.mubr.f32.mxu1 %v311_v1  ;;  %v15_v7 = vld [vmem:[%s391_s1 + $0x10] sm:$0xff] }
   0x2   :  { %v21_v3 = vcombine.high %v17_v0, %v17_v0  ;;  %v22_v4 = vcombine.high %v18_v2, %v18_v2  ;;  %v13_v5 = vld [vmem:[%s391_s1] sm:$0xff]  ;;  %v14_v6 = vld [vmem:[%s391_s1 + $0x8] sm:$0xff]  ;;  %v16_v8 = vld [vmem:[%s391_s1 + $0x18] sm:$0xff] }
   0x4   :  { %296 = vmatprep.subr.msk.mxu0 %vm36_vm0, %v21_v3  ;;  %302 = vmatprep.subr.msk.mxu1 %vm36_vm0, %v22_v4 }
   0x5   :  { %297 = vmatpush1.msk.msra.mxu0 %vm36_vm0, %v17_v0  ;;  %303 = vmatpush1.msk.msra.mxu1 %vm36_vm0, %v18_v2 }
   0x6   :  { %298 = vmatmul.mubr.msk.f32.vlgmr.msra.gmra.mrb[0].mxu0 %vm23_vm1, %v13_v5  ;;  %304 = vmatmul.mubr.msk.f32.vlgmr.msra.gmra.mrb[0].mxu1 %vm23_vm1, %v13_v5 }
   0x7   :  { %115 = vmatprep.mubr.f32.mxu0 %v311_v1  ;;  %204 = vmatprep.mubr.f32.mxu1 %v311_v1 }
   0xa   :  { %299 = vmatmul.mubr.msk.f32.gmra.mrb[2].mxu0 %vm23_vm1, %v14_v6  ;;  %305 = vmatmul.mubr.msk.f32.gmra.mrb[2].mxu1 %vm23_vm1, %v14_v6 }
   0xb   :  { %121 = vmatprep.mubr.f32.mxu0 %v311_v1  ;;  %210 = vmatprep.mubr.f32.mxu1 %v311_v1 }
   0xe   :  { %300 = vmatmul.mubr.msk.f32.gmra.mrb[4].mxu0 %vm23_vm1, %v15_v7  ;;  %306 = vmatmul.mubr.msk.f32.gmra.mrb[4].mxu1 %vm23_vm1, %v15_v7 }
   0xf   :  { %127 = vmatprep.mubr.f32.mxu0 %v311_v1  ;;  %216 = vmatprep.mubr.f32.mxu1 %v311_v1 }
  0x12   :  { %301 = vmatmul.mubr.msk.f32.gmra.mrb[6].mxu0 %vm23_vm1, %v16_v8  ;;  %307 = vmatmul.mubr.msk.f32.gmra.mrb[6].mxu1 %vm23_vm1, %v16_v8 }
  0xd9   :  { %v111_v9 = vpop.f32.mrb[0].mxu0  ;;  %v200_v10 = vpop.f32.mrb[0].mxu1 }
  0xda   :  { %v248_v11 = vmul.f32 %v111_v9, %v111_v9  ;;  %v113_v12 = vpop.f32.mrb[1].mxu0  ;;  %v202_v13 = vpop.f32.mrb[1].mxu1  ;;  %v250_v16 = vmul.f32 %v200_v10, %v200_v10 }
  0xdb   :  { %v223_v14 = vadd.f32 %v113_v12, %v111_v9  ;;  %v249_v15 = vmul.f32 %v113_v12, %v113_v12  ;;  %v251_v28 = vmul.f32 %v202_v13, %v202_v13 }
  0xdd   :  { %v264_v17 = vadd.f32 %v249_v15, %v248_v11  ;;  %v224_v18 = vadd.f32 %v223_v14, %v200_v10  ;;  %v117_v19 = vpop.f32.mrb[2].mxu0  ;;  %v206_v20 = vpop.f32.mrb[2].mxu1 }
  0xde   :  { %v252_v21 = vmul.f32 %v117_v19, %v117_v19  ;;  %v119_v22 = vpop.f32.mrb[3].mxu0  ;;  %v208_v23 = vpop.f32.mrb[3].mxu1  ;;  %v254_v26 = vmul.f32 %v206_v20, %v206_v20 }
  0xdf   :  { %v228_v24 = vadd.f32 %v119_v22, %v117_v19  ;;  %v253_v25 = vmul.f32 %v119_v22, %v119_v22  ;;  %v225_v27 = vadd.f32 %v224_v18, %v202_v13  ;;  %v265_v29 = vadd.f32 %v264_v17, %v250_v16 }
  0xe0   :  { %v255_v38 = vmul.f32 %v208_v23, %v208_v23 }
  0xe1   :  { %v269_v30 = vadd.f32 %v253_v25, %v252_v21  ;;  %v229_v31 = vadd.f32 %v228_v24, %v206_v20  ;;  %226 = vadd.xlane.f32.xlu0 %v225_v27  ;;  %v123_v32 = vpop.f32.mrb[4].mxu0  ;;  %v212_v33 = vpop.f32.mrb[4].mxu1  ;;  %v266_v36 = vadd.f32 %v265_v29, %v251_v28 }
  0xe2   :  { %v256_v34 = vmul.f32 %v123_v32, %v123_v32  ;;  %v125_v35 = vpop.f32.mrb[5].mxu0  ;;  %v214_v37 = vpop.f32.mrb[5].mxu1  ;;  %v258_v42 = vmul.f32 %v212_v33, %v212_v33 }
  0xe3   :  { %v233_v39 = vadd.f32 %v125_v35, %v123_v32  ;;  %v257_v40 = vmul.f32 %v125_v35, %v125_v35  ;;  %v270_v41 = vadd.f32 %v269_v30, %v254_v26  ;;  %v230_v43 = vadd.f32 %v229_v31, %v208_v23 }
  0xe4   :  { %v259_v51 = vmul.f32 %v214_v37, %v214_v37 }
  0xe5   :  { %v274_v44 = vadd.f32 %v257_v40, %v256_v34  ;;  %v234_v45 = vadd.f32 %v233_v39, %v212_v33  ;;  %267 = vadd.xlane.f32.xlu0 %v266_v36  ;;  %v129_v46 = vpop.f32.mrb[6].mxu0  ;;  %v271_v47 = vadd.f32 %v270_v41, %v255_v38  ;;  %v218_v48 = vpop.f32.mrb[6].mxu1 }
  0xe6   :  { %v260_v49 = vmul.f32 %v129_v46, %v129_v46  ;;  %v131_v50 = vpop.f32.mrb[7].mxu0  ;;  %v220_v52 = vpop.f32.mrb[7].mxu1  ;;  %v262_v55 = vmul.f32 %v218_v48, %v218_v48 }
  0xe7   :  { %v238_v53 = vadd.f32 %v131_v50, %v129_v46  ;;  %v261_v54 = vmul.f32 %v131_v50, %v131_v50  ;;  %272 = vadd.xlane.f32.xlu1 %v271_v47  ;;  %v235_v56 = vadd.f32 %v234_v45, %v214_v37  ;;  %v275_v57 = vadd.f32 %v274_v44, %v258_v42 }
  0xe8   :  { %v263_v60 = vmul.f32 %v220_v52, %v220_v52 }
  0xe9   :  { %v279_v58 = vadd.f32 %v261_v54, %v260_v49  ;;  %v239_v59 = vadd.f32 %v238_v53, %v218_v48  ;;  %231 = vadd.xlane.f32.xlu0 %v230_v43  ;;  %v276_v61 = vadd.f32 %v275_v57, %v259_v51 }
  0xeb   :  { %v240_v62 = vadd.f32 %v239_v59, %v220_v52  ;;  %236 = vadd.xlane.f32.xlu1 %v235_v56  ;;  %v280_v63 = vadd.f32 %v279_v58, %v262_v55 }
  0xed   :  { %277 = vadd.xlane.f32.xlu0 %v276_v61  ;;  %v281_v0 = vadd.f32 %v280_v63, %v263_v60 }
  0xef   :  { %241 = vadd.xlane.f32.xlu1 %v240_v62 }
  0xf3   :  { %282 = vadd.xlane.f32.xlu1 %v281_v0 }
 0x16e   :  { %v227_v1 = vpop.xlane.xlu0 %226 }
 0x16f   :  { %244 = vst.msk [vmem:[%s392_s2] sm:$0xff] %vm243_vm2, %v227_v1 }
 0x172   :  { %v268_v2 = vpop.xlane.xlu0 %267 }
 0x173   :  { %284 = vst.msk [vmem:[%s393_s3] sm:$0xff] %vm243_vm2, %v268_v2 }
 0x174   :  { %v273_v3 = vpop.xlane.xlu1 %272 }
 0x175   :  { %285 = vst.msk [vmem:[%s393_s3 + $0x8] sm:$0xff] %vm243_vm2, %v273_v3 }
 0x176   :  { %v232_v4 = vpop.xlane.xlu0 %231 }
 0x177   :  { %245 = vst.msk [vmem:[%s392_s2 + $0x8] sm:$0xff] %vm243_vm2, %v232_v4 }
 0x178   :  { %v237_v5 = vpop.xlane.xlu1 %236 }
 0x179   :  { %246 = vst.msk [vmem:[%s392_s2 + $0x10] sm:$0xff] %vm243_vm2, %v237_v5 }
 0x17a   :  { %v278_v6 = vpop.xlane.xlu0 %277 }
 0x17b   :  { %286 = vst.msk [vmem:[%s393_s3 + $0x10] sm:$0xff] %vm243_vm2, %v278_v6 }
 0x17c   :  { %v242_v7 = vpop.xlane.xlu1 %241 }
 0x17d   :  { %247 = vst.msk [vmem:[%s392_s2 + $0x18] sm:$0xff] %vm243_vm2, %v242_v7 }
 0x180   :  { %v283_v8 = vpop.xlane.xlu1 %282 }
 0x181   :  { %287 = vst.msk [vmem:[%s393_s3 + $0x18] sm:$0xff] %vm243_vm2, %v283_v8 }

</bundles_post_ra>
